<compile_context>
chip_gen: v5e
topology: v5e:2x2
jax: 0.10.0
libtpu: 0.0.40
codegen_flags: <defaults>
</compile_context>

<pallas_src>
import math

import jax
import jax.numpy as jnp
from jax import lax
from jax.experimental import pallas as pl
from jax.experimental.pallas import tpu as pltpu

_LANE = 128


def _round_up(x, m):
    return -(-x // m) * m


def _vmem_limit_bytes():
    """Scoped VMEM limit with headroom; v7x has half the VMEM of v5e/v6e."""
    try:
        cap = int(pltpu.get_tpu_info().vmem_capacity_bytes)
    except Exception:
        cap = 64 * 1024 * 1024          # conservative (v7x-sized) fallback
    return min(cap // 2, 64 * 1024 * 1024)


def _pick_repack(ct):
    """Original rows packed per lane-row (R) so the logits row is lane dense."""
    if ct % _LANE == 0:
        return 1
    r_align = _LANE // math.gcd(ct, _LANE)   # minimal R with R*CT % 128 == 0
    if r_align * ct <= 2048:                 # exact alignment is cheap -> take it
        return r_align
    return max(1, -(-512 // ct))             # otherwise just get >= 512 lanes


def _pick_block_rows(bp_rows, lw, tw, logit_bytes, vmem_limit):
    """Largest packed-row tile whose working set fits the VMEM budget."""
    budget = int(vmem_limit * 0.7)
    lw_pad = _round_up(lw, _LANE)
    tw_pad = _round_up(tw, _LANE)
    fixed = 4 * _round_up(tw, 16) * lw_pad        # bf16 expander, double-buffered
    per_row = (2 * lw_pad * logit_bytes           # logits block, double-buffered
               + 2 * tw_pad * 2                   # bf16 targets block, double-buffered
               + 6 * lw_pad * 4)                  # ~6 live f32 temporaries
    tb = max(budget - fixed, per_row) // per_row
    if tb >= bp_rows:
        return bp_rows                            # single full-extent block
    tb = max(32, tb - tb % 32)                    # sublane pack for bf16/int8 too
    return min(tb, bp_rows)


def corn_loss_multi(logits, targets, class_labels_num, block_rows=None):
    """CORN multi-head loss.

    Args:
      logits : [B, C * class_labels_num] float (any float dtype; cast in-kernel)
      targets: [B, C] integer labels in [0, class_labels_num]
      block_rows: optional override for the packed-row tile size.
    Returns:
      scalar float32 loss (mean over the C heads of the per-head CORN loss).
    """
    B, total = logits.shape
    T = int(class_labels_num)
    assert total % T == 0
    assert T <= 256  # targets travel as bf16 (exact for small integers)
    C = total // T
    CT = C * T

    targets_i = targets.astype(jnp.int32)

    # Per-head denominator: sum_b min(y+1, T).  Tiny [B, C] reduce in plain JAX.
    cnt_c = jnp.sum(jnp.clip(targets_i + 1, 0, T), axis=0).astype(jnp.float32)

    # ---- lane-dense repack: [B, CT] -> [bp_rows, R*CT] ----------------------
    R = _pick_repack(CT)
    padB = _round_up(B, R)
    LW = R * CT                                   # packed logits row width
    TW = R * C                                    # packed targets row width
    if padB != B:
        logits_p = jnp.pad(logits, ((0, padB - B), (0, 0)))
        targets_p = jnp.pad(targets_i, ((0, padB - B), (0, 0)), constant_values=-1)
    else:
        logits_p, targets_p = logits, targets_i
    bp_rows = padB // R
    logits_pk = logits_p.reshape(bp_rows, LW)
    targets_pk = targets_p.reshape(bp_rows, TW).astype(jnp.bfloat16)

    # Block-diagonal one-hot expander: y_exp[b, r*CT + c*T + t] = y[b, r*C + c].
    col = jnp.arange(LW, dtype=jnp.int32)
    owner = (col // CT) * C + (col % CT) // T
    expander = (jnp.arange(TW, dtype=jnp.int32)[:, None] == owner[None, :]
                ).astype(jnp.bfloat16)

    vmem_limit = _vmem_limit_bytes()
    lb = jnp.dtype(logits.dtype).itemsize
    if block_rows is None:
        TBp = _pick_block_rows(bp_rows, LW, TW, lb, vmem_limit)
    else:
        TBp = min(int(block_rows), bp_rows)
        if TBp < bp_rows:
            TBp = min(max(16, TBp - TBp % 16), bp_rows)

    nb = pl.cdiv(bp_rows, TBp)                    # number of batch tiles
    G = 2 if nb >= 2 else 1                       # always engage both v7x TCs
    NBPG = pl.cdiv(nb, G)                         # tiles per group
    has_clamped_tail = (G * NBPG) > nb            # odd nb: one duplicated tile
    ragged_last = (bp_rows % TBp) != 0            # partial last real tile

    def tile_index(g, i):
        t = g * NBPG + i
        if has_clamped_tail:
            t = jnp.minimum(t, nb - 1)
        return t

    def kernel(logits_ref, targets_ref, exp_ref, loss_ref):
        g = pl.program_id(0)
        i = pl.program_id(1)

        @pl.when(i == 0)
        def _init():
            loss_ref[...] = jnp.zeros_like(loss_ref)

        def _accumulate():
            z = logits_ref[...].astype(jnp.float32)          # [TBp, LW]
            y = targets_ref[...]                             # [TBp, TW] bf16

            if ragged_last:
                # Mask the padded tail rows on the narrow targets only:
                # y := -1 zeroes every comparison downstream (select, not mul).
                tile = g * NBPG + i
                rows = tile * TBp + lax.broadcasted_iota(jnp.int32, (TBp, 1), 0)
                y = jnp.where(rows < bp_rows, y, -1)

            # Expand targets across each head's T task lanes (bf16 MXU matmul).
            y_exp = jnp.dot(y, exp_ref[...],
                            preferred_element_type=jnp.float32)      # [TBp, LW]

            colv = lax.broadcasted_iota(jnp.int32, (1, LW), 1)
            task = (colv % T).astype(jnp.float32)                    # [1, LW]

            # Branch-free CORN per-element loss:
            #   y >  task : softplus(-z) = max(-z, 0) + log1p(exp(-|z|))
            #   y == task : softplus( z) = max( z, 0) + log1p(exp(-|z|))
            #   y <  task : 0
            base = jnp.log1p(jnp.exp(-jnp.abs(z)))
            hinge = jnp.maximum(jnp.where(y_exp > task, -z, z), 0.0)
            per = jnp.where(y_exp >= task, base + hinge, 0.0)

            loss_ref[...] += jnp.sum(per, axis=0, keepdims=True)[None]

        if has_clamped_tail:
            # Skip the duplicated (index-clamped) out-of-range tail tile.
            pl.when(g * NBPG + i < nb)(_accumulate)
        else:
            _accumulate()

    grid_spec = pltpu.PrefetchScalarGridSpec(
        num_scalar_prefetch=0,
        grid=(G, NBPG),
        in_specs=[
            pl.BlockSpec((TBp, LW), lambda g, i: (tile_index(g, i), 0)),  # logits
            pl.BlockSpec((TBp, TW), lambda g, i: (tile_index(g, i), 0)),  # targets
            pl.BlockSpec((TW, LW), lambda g, i: (0, 0)),                  # expander
        ],
        out_specs=pl.BlockSpec((1, 1, LW), lambda g, i: (g, 0, 0)),       # partials
    )

    cost = pl.CostEstimate(
        flops=int(padB * CT * 11 + 2 * bp_rows * TW * LW),
        transcendentals=int(2 * padB * CT),
        bytes_accessed=int(padB * CT * lb + bp_rows * TW * 2
                           + TW * LW * 2 + G * LW * 4),
    )

    loss_part = pl.pallas_call(
        kernel,
        out_shape=jax.ShapeDtypeStruct((G, 1, LW), jnp.float32),
        grid_spec=grid_spec,
        compiler_params=pltpu.CompilerParams(
            dimension_semantics=("parallel", "arbitrary"),
            vmem_limit_bytes=vmem_limit,
        ),
        cost_estimate=cost,
    )(logits_pk, targets_pk, expander)

    # Tiny epilogue in plain JAX: fold packed columns back to per-head sums.
    loss_cols = jnp.sum(loss_part, axis=(0, 1))               # [LW]
    loss_c = loss_cols.reshape(R, C, T).sum(axis=(0, 2))      # [C]
    return jnp.mean(loss_c / cnt_c)


def corn_loss_multi_ref(logits, targets, class_labels_num):
    """Pure-JAX reference mirroring coral_pytorch.corn_loss + CornLossMulti.forward."""
    B, total = logits.shape
    T = class_labels_num
    C = total // T
    z = logits.astype(jnp.float32).reshape(B, C, T)
    y = targets.astype(jnp.int32)[:, :, None]
    task = jnp.arange(T, dtype=jnp.int32)[None, None, :]
    mask = (y >= task).astype(jnp.float32)
    label = (y > task).astype(jnp.float32)
    ls = jax.nn.log_sigmoid(z)
    per = -(ls * label + (ls - z) * (1.0 - label)) * mask
    loss_c = jnp.sum(per, axis=(0, 2))
    cnt_c = jnp.sum(mask, axis=(0, 2))
    return jnp.mean(loss_c / cnt_c)


# TODO(synk): logits2labels / logits2probabilities helper methods of the module
# (inference-time utilities, not part of forward) are not implemented here.

if __name__ == "__main__":
    key = jax.random.PRNGKey(0)
    k1, k2 = jax.random.split(key)

    class_labels_num = 4   # T tasks per head (K = 5 ordinal classes)
    C = 3                  # number of heads

    # Small single-block config (batch not a multiple of the repack factor R=32).
    B0 = 50
    logits0 = jax.random.normal(k1, (B0, C * class_labels_num), dtype=jnp.float32)
    targets0 = jax.random.randint(k2, (B0, C), 0, class_labels_num + 1, dtype=jnp.int32)
    ref0 = corn_loss_multi_ref(logits0, targets0, class_labels_num)
    out0 = jax.block_until_ready(corn_loss_multi(logits0, targets0, class_labels_num))

    # Tiled config: odd number of batch tiles -> exercises the two-group split with
    # a clamped duplicate tail tile plus a ragged (partial) last real tile.
    B1 = 1200
    k3, k4 = jax.random.split(k2)
    logits1 = jax.random.normal(k3, (B1, C * class_labels_num), dtype=jnp.float32)
    targets1 = jax.random.randint(k4, (B1, C), 0, class_labels_num + 1, dtype=jnp.int32)
    ref1 = corn_loss_multi_ref(logits1, targets1, class_labels_num)
    out1 = jax.block_until_ready(
        corn_loss_multi(logits1, targets1, class_labels_num, block_rows=16))

    # Auto tile size on the larger batch.
    out1_auto = jax.block_until_ready(
        corn_loss_multi(logits1, targets1, class_labels_num))

    # Native-dtype (bf16) logits, cast to f32 inside the kernel.
    logits1_bf16 = logits1.astype(jnp.bfloat16)
    ref1_bf16 = corn_loss_multi_ref(logits1_bf16.astype(jnp.float32), targets1,
                                    class_labels_num)
    out1_bf16 = jax.block_until_ready(
        corn_loss_multi(logits1_bf16, targets1, class_labels_num, block_rows=16))

    assert jnp.allclose(out0, ref0, rtol=1e-4, atol=1e-4), (out0, ref0)
    assert jnp.allclose(out1, ref1, rtol=1e-4, atol=1e-4), (out1, ref1)
    assert jnp.allclose(out1_auto, ref1, rtol=1e-4, atol=1e-4), (out1_auto, ref1)
    assert jnp.allclose(out1_bf16, ref1_bf16, rtol=1e-4, atol=1e-4), (out1_bf16, ref1_bf16)

    print("KERNEL_OK")
</pallas_src>

<mosaic_0001>
module attributes {stable_mosaic.version = 11 : i64} {
  func.func @kernel(%arg0: i32, %arg1: i32, %arg2: memref<2x384xf32, #tpu.memory_space<vmem>>, %arg3: memref<2x96xbf16, #tpu.memory_space<vmem>>, %arg4: memref<96x384xbf16, #tpu.memory_space<vmem>>, %arg5: memref<1x1x384xf32, #tpu.memory_space<vmem>>) attributes {dimension_semantics = [#tpu.dimension_semantics<parallel>, #tpu.dimension_semantics<arbitrary>], iteration_bounds = array<i64: 1, 1>, scalar_prefetch = 0 : i64, scratch_operands = 0 : i64, tpu.core_type = #tpu.core_type<tc>, window_params = [{transform_indices = @transform_0, window_bounds = array<i64: 2, 384>}, {transform_indices = @transform_1, window_bounds = array<i64: 2, 96>}, {pipeline_mode = #tpu.pipeline_mode<synchronous>, transform_indices = @transform_2, window_bounds = array<i64: 96, 384>}, {transform_indices = @transform_3, window_bounds = array<i64: 1, 1, 384>}]} {
    %c0_i32 = arith.constant 0 : i32
    %0 = arith.cmpi eq, %arg1, %c0_i32 : i32
    %1 = arith.extui %0 : i1 to i32
    %c0_i32_0 = arith.constant 0 : i32
    %2 = arith.cmpi ne, %1, %c0_i32_0 : i32
    scf.if %2 {
      %cst_21 = arith.constant 0.000000e+00 : f32
      %48 = vector.broadcast %cst_21 : f32 to vector<1x1x384xf32>
      %c0_22 = arith.constant 0 : index
      %c0_23 = arith.constant 0 : index
      %c0_24 = arith.constant 0 : index
      %49 = vector.load %arg5[%c0_22, %c0_23, %c0_24] : memref<1x1x384xf32, #tpu.memory_space<vmem>>, vector<1x1x384xf32>
      tpu.vector_store %arg5[%c0_22, %c0_23, %c0_24], %48 {strides = array<i32>} : memref<1x1x384xf32, #tpu.memory_space<vmem>>, vector<1x1x384xf32>,
    } else {
    }
    %c0 = arith.constant 0 : index
    %c0_1 = arith.constant 0 : index
    %3 = vector.load %arg2[%c0, %c0_1] : memref<2x384xf32, #tpu.memory_space<vmem>>, vector<2x384xf32>
    %c0_2 = arith.constant 0 : index
    %c0_3 = arith.constant 0 : index
    %4 = vector.load %arg3[%c0_2, %c0_3] : memref<2x96xbf16, #tpu.memory_space<vmem>>, vector<2x96xbf16>
    %c0_4 = arith.constant 0 : index
    %c0_5 = arith.constant 0 : index
    %5 = vector.load %arg4[%c0_4, %c0_5] : memref<96x384xbf16, #tpu.memory_space<vmem>>, vector<96x384xbf16>
    %cst = arith.constant dense<0.000000e+00> : vector<2x384xf32>
    %6 = tpu.matmul %4, %5, %cst {dimension_numbers = #tpu.dot_dimension_numbers<[1], [0], [0], [1], [0, 0, 1, 1], [], []>} : vector<2x96xbf16>, vector<96x384xbf16>, vector<2x384xf32> -> vector<2x384xf32>
    %7 = tpu.iota {dimensions = array<i32: 1>} : vector<1x384xi32>
    %c4_i32 = arith.constant 4 : i32
    %c0_i32_6 = arith.constant 0 : i32
    %8 = arith.cmpi eq, %c4_i32, %c0_i32_6 : i32
    %c1_i32 = arith.constant 1 : i32
    %9 = arith.select %8, %c1_i32, %c4_i32 : i32
    %10 = vector.broadcast %9 : i32 to vector<1x384xi32>
    %11 = arith.remsi %7, %10 : vector<1x384xi32>
    %c0_i32_7 = arith.constant 0 : i32
    %12 = vector.broadcast %c0_i32_7 : i32 to vector<1x384xi32>
    %13 = arith.cmpi ne, %11, %12 : vector<1x384xi32>
    %c0_i32_8 = arith.constant 0 : i32
    %14 = vector.broadcast %c0_i32_8 : i32 to vector<1x384xi32>
    %15 = arith.cmpi slt, %11, %14 : vector<1x384xi32>
    %c0_i32_9 = arith.constant 0 : i32
    %16 = arith.cmpi slt, %9, %c0_i32_9 : i32
    %17 = vector.broadcast %16 : i1 to vector<1x384xi1>
    %18 = vector.broadcast %17 : vector<1x384xi1> to vector<1x384xi1>
    %19 = arith.xori %15, %18 : vector<1x384xi1>
    %20 = arith.andi %19, %13 : vector<1x384xi1>
    %21 = vector.broadcast %9 : i32 to vector<1x384xi32>
    %22 = arith.addi %11, %21 : vector<1x384xi32>
    %23 = arith.select %20, %22, %11 : vector<1x384xi1>, vector<1x384xi32>
    %24 = arith.sitofp %23 : vector<1x384xi32> to vector<1x384xf32>
    %25 = math.absf %3 : vector<2x384xf32>
    %cst_10 = arith.constant 0.000000e+00 : f32
    %26 = vector.broadcast %cst_10 : f32 to vector<2x384xf32>
    %27 = arith.subf %26, %25 : vector<2x384xf32>
    %28 = math.exp %27 : vector<2x384xf32>
    %29 = math.log1p %28 : vector<2x384xf32>
    %30 = vector.broadcast %24 : vector<1x384xf32> to vector<2x384xf32>
    %31 = arith.cmpf ogt, %6, %30 : vector<2x384xf32>
    %cst_11 = arith.constant 0.000000e+00 : f32
    %32 = vector.broadcast %cst_11 : f32 to vector<2x384xf32>
    %33 = arith.subf %32, %3 : vector<2x384xf32>
    %34 = arith.select %31, %33, %3 : vector<2x384xi1>, vector<2x384xf32>
    %cst_12 = arith.constant 0.000000e+00 : f32
    %35 = vector.broadcast %cst_12 : f32 to vector<2x384xf32>
    %36 = arith.maximumf %34, %35 : vector<2x384xf32>
    %37 = vector.broadcast %24 : vector<1x384xf32> to vector<2x384xf32>
    %38 = arith.cmpf oge, %6, %37 : vector<2x384xf32>
    %39 = arith.addf %29, %36 : vector<2x384xf32>
    %cst_13 = arith.constant 0.000000e+00 : f32
    %40 = vector.broadcast %cst_13 : f32 to vector<2x384xf32>
    %41 = arith.select %38, %39, %40 : vector<2x384xi1>, vector<2x384xf32>
    %c0_14 = arith.constant 0 : index
    %c0_15 = arith.constant 0 : index
    %c0_16 = arith.constant 0 : index
    %42 = vector.load %arg5[%c0_14, %c0_15, %c0_16] : memref<1x1x384xf32, #tpu.memory_space<vmem>>, vector<1x1x384xf32>
    %cst_17 = arith.constant dense<0.000000e+00> : vector<384xf32>
    %43 = vector.multi_reduction <add>, %41, %cst_17 [0] : vector<2x384xf32> to vector<384xf32>
    %44 = vector.shape_cast %43 : vector<384xf32> to vector<1x384xf32>
    %45 = vector.shape_cast %44 : vector<1x384xf32> to vector<1x1x384xf32>
    %46 = arith.addf %42, %45 : vector<1x1x384xf32>
    %c0_18 = arith.constant 0 : index
    %c0_19 = arith.constant 0 : index
    %c0_20 = arith.constant 0 : index
    %47 = vector.load %arg5[%c0_18, %c0_19, %c0_20] : memref<1x1x384xf32, #tpu.memory_space<vmem>>, vector<1x1x384xf32>
    tpu.vector_store %arg5[%c0_18, %c0_19, %c0_20], %46 {strides = array<i32>} : memref<1x1x384xf32, #tpu.memory_space<vmem>>, vector<1x1x384xf32>,
    return
  }
  func.func @transform_0(%arg0: i32, %arg1: i32) -> (i32, i32) {
    %c1_i32 = arith.constant 1 : i32
    %0 = arith.muli %arg0, %c1_i32 : i32
    %1 = arith.addi %0, %arg1 : i32
    %c0_i32 = arith.constant 0 : i32
    %c0_i32_0 = arith.constant 0 : i32
    return %1, %c0_i32 : i32, i32
  }
  func.func @transform_1(%arg0: i32, %arg1: i32) -> (i32, i32) {
    %c1_i32 = arith.constant 1 : i32
    %0 = arith.muli %arg0, %c1_i32 : i32
    %1 = arith.addi %0, %arg1 : i32
    %c0_i32 = arith.constant 0 : i32
    %c0_i32_0 = arith.constant 0 : i32
    return %1, %c0_i32 : i32, i32
  }
  func.func @transform_2(%arg0: i32, %arg1: i32) -> (i32, i32) {
    %c0_i32 = arith.constant 0 : i32
    %c0_i32_0 = arith.constant 0 : i32
    %c0_i32_1 = arith.constant 0 : i32
    return %c0_i32, %c0_i32_0 : i32, i32
  }
  func.func @transform_3(%arg0: i32, %arg1: i32) -> (i32, i32, i32) {
    %c0_i32 = arith.constant 0 : i32
    %c0_i32_0 = arith.constant 0 : i32
    %c0_i32_1 = arith.constant 0 : i32
    return %arg0, %c0_i32, %c0_i32_0 : i32, i32, i32
  }
}

</mosaic_0001>

<bundles_post_ra>
// kernel: tpu_custom_call.1
= control target key start
LH: loop header
LB: loop body
LE: loop exit
PB: predicated region body
PF: predicated region fallthrough
CT: control target
= control target key end

     0   :  { %8 = vsyncpa [#allocation3], 0  ;;  %s661_s0 = inlined_call_operand.hbm [shape: f32[2,384], index: 0, kind: input, shape index: {}]   ;;  %s662_s1 = inlined_call_operand.hbm [shape: bf16[2,96], index: 1, kind: input, shape index: {}]   ;;  %s663_s2 = inlined_call_operand.hbm [shape: bf16[96,384], index: 2, kind: input, shape index: {}]   ;;  %s664_s3 = inlined_call_operand.hbm [shape: f32[1,1,384], index: 3, kind: output, shape index: {}]  }
   0x1   :  { %9 = vsyncpa [#allocation6], 0  ;;  %s33_s14 = sshll.u32 %s662_s1, 4  ;;  %s34_s14 = int_to_ptr.hbm [resolvable:$true] %s33_s14 }
   0x2   :  { %10 = vsyncpa [#allocation4], 0  ;;  %s609_s15 = smov [#allocation5]   ;;  %s20_s19 = sshll.u32 %s661_s0, 4  ;;  %s21_s19 = int_to_ptr.hbm [resolvable:$true] %s20_s19 }
   0x3   :  { %s35_s16 = sshll.u32 %s609_s15, 4  ;;  %s610_s20 = smov [#allocation2]   ;;  %s36_s16 = int_to_ptr.vmem [resolvable:$true] %s35_s16 }
   0x4   :  { %38 = dma.hbm_to_vmem [thread:$0]  %s34_s14, 16, %s36_s16, [#allocation6]  }
   0x5   :  { %s22_s21 = sshll.u32 %s610_s20, 4  ;;  %s43_s24 = sshll.u32 %s663_s2, 4  ;;  %s23_s21 = int_to_ptr.vmem [resolvable:$true] %s22_s21  ;;  %s44_s24 = int_to_ptr.hbm [resolvable:$true] %s43_s24 }
   0x6   :  { %25 = dma.hbm_to_vmem [thread:$0]  %s21_s19, 96, %s23_s21, [#allocation3]  }
   0x7   :  { %s611_s1 = smov [#allocation7]   ;;  %s612_s26 = smov 192  }
   0x8   :  { %s45_s25 = sshll.u32 %s611_s1, 4  ;;  %s613_s27 = smov 12   ;;  %s46_s25 = int_to_ptr.vmem [resolvable:$true] %s45_s25 }
   0x9   :  { %51 = dma.hbm_to_vmem [thread:$0]  %s44_s24, 2304, %s46_s25, [#allocation6], %s612_s26, %s612_s26, %s613_s27  }
   0xa   :  { %603 = dma.done.wait [#allocation3], 96  }
   0xb   :  { %604 = vsyncadd [#allocation3], 4294967200 }
   0xc   :  { %605 = dma.done.wait [#allocation6], 2320  }
   0xd   :  { %606 = vsyncadd [#allocation6], 4294964976  ;;  %v465_v0 = vld [vmem:[#allocation7 + $0x78] sm:$0xf]  ;;  %v494_v1 = vld [vmem:[#allocation7 + $0x80] sm:$0xf0]  ;;  %v71_v62 = vlaneseq }
   0xe   :  { %v493_v2 = vld [vmem:[#allocation7 + $0x7c] sm:$0xf]  ;;  %v466_v3 = vor.u32 %v494_v1, %v465_v0  ;;  %v467_v4 = vld [vmem:[#allocation7 + $0x84] sm:$0xf0]  ;;  %v473_v5 = vld [vmem:[#allocation7 + $0x80] sm:$0xf] }
   0xf   :  { %v495_v6 = vld [vmem:[#allocation7 + $0x88] sm:$0xf0]  ;;  %v470_v7 = vor.u32 %v493_v2, %v467_v4  ;;  %v453_v9 = vld [vmem:[#allocation7 + $0x60] sm:$0xf]  ;;  %v490_v11 = vld [vmem:[#allocation7 + $0x64] sm:$0xf] }
  0x10   :  { %v474_v8 = vor.u32 %v495_v6, %v473_v5  ;;  %v491_v10 = vld [vmem:[#allocation7 + $0x68] sm:$0xf0]  ;;  %204 = vmatpush.bf16.msra.mxu0 %v466_v3  ;;  %v455_v13 = vld [vmem:[#allocation7 + $0x6c] sm:$0xf0]  ;;  %v461_v14 = vld [vmem:[#allocation7 + $0x68] sm:$0xf] }
  0x11   :  { %v454_v12 = vor.u32 %v491_v10, %v453_v9  ;;  %v492_v15 = vld [vmem:[#allocation7 + $0x70] sm:$0xf0]  ;;  %217 = vmatpush.bf16.msra.mxu1 %v470_v7  ;;  %v458_v16 = vor.u32 %v490_v11, %v455_v13  ;;  %v441_v18 = vld [vmem:[#allocation7 + $0x48] sm:$0xf]  ;;  %v487_v20 = vld [vmem:[#allocation7 + $0x4c] sm:$0xf] }
  0x12   :  { %230 = vmatpush.bf16.msra.mxu2 %v474_v8  ;;  %v462_v17 = vor.u32 %v492_v15, %v461_v14  ;;  %v488_v19 = vld [vmem:[#allocation7 + $0x50] sm:$0xf0]  ;;  %v443_v21 = vld [vmem:[#allocation7 + $0x54] sm:$0xf0]  ;;  %v449_v22 = vld [vmem:[#allocation7 + $0x50] sm:$0xf] }
  0x13   :  { %v489_v23 = vld [vmem:[#allocation7 + $0x58] sm:$0xf0]  ;;  %v442_v24 = vor.u32 %v488_v19, %v441_v18  ;;  %v446_v25 = vor.u32 %v487_v20, %v443_v21  ;;  %v429_v27 = vld [vmem:[#allocation7 + $0x30] sm:$0xf]  ;;  %v484_v29 = vld [vmem:[#allocation7 + $0x34] sm:$0xf] }
  0x14   :  { %205 = vmatpush.bf16.msra.mxu0 %v454_v12  ;;  %v450_v26 = vor.u32 %v489_v23, %v449_v22  ;;  %v485_v28 = vld [vmem:[#allocation7 + $0x38] sm:$0xf0]  ;;  %v431_v30 = vld [vmem:[#allocation7 + $0x3c] sm:$0xf0]  ;;  %v437_v31 = vld [vmem:[#allocation7 + $0x38] sm:$0xf] }
  0x15   :  { %218 = vmatpush.bf16.msra.mxu1 %v458_v16  ;;  %v486_v32 = vld [vmem:[#allocation7 + $0x40] sm:$0xf0]  ;;  %v430_v33 = vor.u32 %v485_v28, %v429_v27  ;;  %v434_v34 = vor.u32 %v484_v29, %v431_v30  ;;  %v417_v36 = vld [vmem:[#allocation7 + $0x18] sm:$0xf]  ;;  %v481_v38 = vld [vmem:[#allocation7 + $0x1c] sm:$0xf] }
  0x16   :  { %231 = vmatpush.bf16.msra.mxu2 %v462_v17  ;;  %v438_v35 = vor.u32 %v486_v32, %v437_v31  ;;  %v482_v37 = vld [vmem:[#allocation7 + $0x20] sm:$0xf0]  ;;  %v419_v39 = vld [vmem:[#allocation7 + $0x24] sm:$0xf0]  ;;  %v425_v40 = vld [vmem:[#allocation7 + $0x20] sm:$0xf] }
  0x17   :  { %v483_v41 = vld [vmem:[#allocation7 + $0x28] sm:$0xf0]  ;;  %v418_v42 = vor.u32 %v482_v37, %v417_v36  ;;  %v422_v43 = vor.u32 %v481_v38, %v419_v39  ;;  %v405_v45 = vld [vmem:[#allocation7] sm:$0xf]  ;;  %v478_v47 = vld [vmem:[#allocation7 + $0x4] sm:$0xf] }
  0x18   :  { %206 = vmatpush.bf16.msra.mxu0 %v442_v24  ;;  %v426_v44 = vor.u32 %v483_v41, %v425_v40  ;;  %v479_v46 = vld [vmem:[#allocation7 + $0x8] sm:$0xf0]  ;;  %v407_v48 = vld [vmem:[#allocation7 + $0xc] sm:$0xf0]  ;;  %v413_v49 = vld [vmem:[#allocation7 + $0x8] sm:$0xf] }
  0x19   :  { %219 = vmatpush.bf16.msra.mxu1 %v446_v25  ;;  %v480_v50 = vld [vmem:[#allocation7 + $0x10] sm:$0xf0]  ;;  %v406_v51 = vor.u32 %v479_v46, %v405_v45  ;;  %v410_v52 = vor.u32 %v478_v47, %v407_v48  ;;  %v77_v54 = vld [vmem:[#allocation5] sm:$0x1]  ;;  %vm198_vm0 = vcmask 785408   ;;  %v242_v0 = vand.u32 127, %v71_v62 }
  0x1a   :  { %232 = vmatpush.bf16.msra.mxu2 %v450_v26  ;;  %v414_v53 = vor.u32 %v480_v50, %v413_v49  ;;  %v76_v55 = vld [vmem:[#allocation2] sm:$0x3f]  ;;  %vm645_vm3 = vcmp.lt.s32.totalorder %v71_v62, 384  ;;  %v614_v21 = vmov 0.0   ;;  %vm331_vm4 = vcmask 1041408   ;;  %s615_s0 = smov [#allocation8]  }
  0x1b   :  { %v300_v56 = vsub.f32 0.0, %v76_v55  ;;  %v284_v60 = vand.u32 2147483647, %v76_v55  ;;  %v243_v1 = vadd.s32 128, %v242_v0  ;;  %v249_v3 = vand.u32 3, %v242_v0  ;;  %s390_s2 = sshll.u32 %s615_s0, 4  ;;  %s391_s2 = int_to_ptr.vmem [resolvable:$true] %s390_s2 }
  0x1c   :  { %207 = vmatpush.bf16.msra.mxu0 %v430_v33  ;;  %v244_v6 = vadd.s32 256, %v242_v0  ;;  %75 = vst.msk [vmem:[#allocation8] sm:$0x7] %vm645_vm3, %v614_v21  ;;  %vm333_vm7 = vcmask 1043456   ;;  %vm375_vm11 = vcmask 1040384   ;;  %s392_s30 = sshll.u32 %s664_s3, 4  ;;  %s393_s30 = int_to_ptr.hbm [resolvable:$true] %s392_s30 }
  0x1d   :  { %220 = vmatpush.bf16.msra.mxu1 %v434_v34  ;;  %302 = vst [vmem:[#allocation1] ss:$4 sm:$0xff] %v300_v56  ;;  %v285_v61 = vsub.f32 0.0, %v284_v60  ;;  %v256_v4 = vand.u32 3, %v243_v1  ;;  %v281_v7 = vcvt.s32.f32 %v249_v3 }
  0x1e   :  { %233 = vmatpush.bf16.msra.mxu2 %v438_v35  ;;  %v263_v11 = vand.u32 3, %v244_v6 }
  0x1f   :  { %v286_v63 = vmul.f32 1.442695, %v285_v61  ;;  %v282_v8 = vcvt.s32.f32 %v256_v4 }
  0x20   :  { %208 = vmatpush.bf16.msra.mxu0 %v418_v42  ;;  %v283_v19 = vcvt.s32.f32 %v263_v11 }
  0x21   :  { %221 = vmatpush.bf16.msra.mxu1 %v422_v43  ;;  %503 = vpow2.f32 %v286_v63 }
  0x22   :  { %234 = vmatpush.bf16.msra.mxu2 %v426_v44 }
  0x24   :  { %209 = vmatpush.bf16.msra.mxu0 %v406_v51  ;;  %v303_v57 = vld.sshfl [vmem:[#allocation1] sm:$0xff pattern:$0x73625140]  ;;  %v304_v58 = vld.sshfl [vmem:[#allocation1 + $0x8] sm:$0xff pattern:$0x73625140] }
  0x25   :  { %222 = vmatpush.bf16.msra.mxu1 %v410_v52  ;;  %v305_v59 = vld.sshfl [vmem:[#allocation1 + $0x10] sm:$0xff pattern:$0x73625140] }
  0x26   :  { %235 = vmatpush.bf16.msra.mxu2 %v414_v53  ;;  %310 = vst [vmem:[#allocation1] ss:$4 sm:$0xff] %v76_v55 }
  0x27   :  { %475 = vmatmul.msk.bf16.vlgmr.msra.gmra.mxu0 %vm198_vm0, %v77_v54  ;;  %v504_v2 = vpop.eup %503 }
  0x28   :  { %476 = vmatmul.msk.bf16.vlgmr.msra.gmra.mxu1 %vm198_vm0, %v77_v54  ;;  %v288_v5 = vadd.f32 1.0, %v504_v2  ;;  %v291_v12 = vmul.f32 -0.5, %v504_v2  ;;  %v294_v23 = vand.u32 2147483647, %v504_v2 }
  0x29   :  { %477 = vmatmul.msk.bf16.vlgmr.msra.gmra.mxu2 %vm198_vm0, %v77_v54 }
  0x2a   :  { %505 = vlog2.f32 %v288_v5  ;;  %v292_v20 = vadd.f32 1.0, %v291_v12  ;;  %vm295_vm6 = vcmp.lt.f32.partialorder %v294_v23, 0.0004427343  ;;  %v348_v5 = vld [vmem:[#allocation8] sm:$0x7] }
  0x2c   :  { %v293_v29 = vmul.f32 %v504_v2, %v292_v20 }
  0x2d   :  { %v312_v10 = vld.sshfl [vmem:[#allocation1 + $0x8] sm:$0xff pattern:$0x73625140]  ;;  %v311_v13 = vld.sshfl [vmem:[#allocation1] sm:$0xff pattern:$0x73625140] }
  0x2e   :  { %v313_v24 = vld.sshfl [vmem:[#allocation1 + $0x10] sm:$0xff pattern:$0x73625140] }
  0x30   :  { %v506_v22 = vpop.eup %505 }
  0x31   :  { %v290_v28 = vmul.f32 0.6931472, %v506_v22 }
  0x33   :  { %v296_v35 = vsel %vm295_vm6, %v293_v29, %v290_v28 }
  0xa4   :  { %v211_v9 = vpop.f32.mrf.mxu0 }
  0xa5   :  { %vm297_vm1 = vcmp.gt.f32.partialorder %v211_v9, %v281_v7  ;;  %v224_v14 = vpop.f32.mrf.mxu1  ;;  %vm323_vm8 = vcmp.ge.f32.partialorder %v211_v9, %v281_v7 }
  0xa6   :  { %vm298_vm2 = vcmp.gt.f32.partialorder %v224_v14, %v282_v8  ;;  %v317_v17 = vsel %vm297_vm1, %v303_v57, %v311_v13  ;;  %vm324_vm10 = vcmp.ge.f32.partialorder %v224_v14, %v282_v8 }
  0xa7   :  { %v318_v16 = vsel %vm298_vm2, %v304_v58, %v312_v10  ;;  %v320_v25 = vmax.f32 %v317_v17, 0.0 }
  0xa8   :  { %v321_v18 = vmax.f32 %v318_v16, 0.0 }
  0xaa   :  { %v329_v26 = vrot.slane %v321_v18, 6 }
  0xac   :  { %v237_v27 = vpop.f32.mrf.mxu2  ;;  %v213_v30 = vpop.f32.mrf.mxu0  ;;  %v332_v34 = vsel %vm331_vm4, %v320_v25, %v329_v26 }
  0xad   :  { %vm299_vm5 = vcmp.gt.f32.partialorder %v237_v27, %v283_v19  ;;  %v226_v32 = vpop.f32.mrf.mxu1  ;;  %vm325_vm9 = vcmp.ge.f32.partialorder %v237_v27, %v283_v19 }
  0xae   :  { %v319_v31 = vsel %vm299_vm5, %v305_v59, %v313_v24 }
  0xaf   :  { %v322_v33 = vmax.f32 %v319_v31, 0.0 }
  0xb1   :  { %v330_v36 = vrot.slane %v322_v33, 4 }
  0xb3   :  { %v334_v37 = vsel %vm333_vm7, %v332_v34, %v330_v36 }
  0xb4   :  { %v336_v38 = vadd.f32 %v334_v37, %v296_v35  ;;  %v239_v39 = vpop.f32.mrf.mxu2 }
  0xb6   :  { %338 = vst [vmem:[#allocation1] ss:$4 sm:$0xff] %v336_v38 }
  0xbd   :  { %v341_v40 = vld.sshfl [vmem:[#allocation1 + $0x10] sm:$0xff pattern:$0x73625140]  ;;  %v339_v41 = vld.sshfl [vmem:[#allocation1] sm:$0xff pattern:$0x73625140] }
  0xbe   :  { %v347_v42 = vsel %vm325_vm9, %v341_v40, 0.0  ;;  %v340_v43 = vld.sshfl [vmem:[#allocation1 + $0x8] sm:$0xff pattern:$0x73625140]  ;;  %v345_v44 = vsel %vm323_vm8, %v339_v41, 0.0 }
  0xbf   :  { %v363_v45 = vsel %vm331_vm4, %v347_v42, 0.0  ;;  %v346_v46 = vsel %vm324_vm10, %v340_v43, 0.0  ;;  %v349_v47 = vsel %vm331_vm4, %v345_v44, 0.0 }
  0xc0   :  { %v364_v48 = vrot.slane %v363_v45, 4  ;;  %v350_v49 = vrot.slane %v349_v47, 4  ;;  %v356_v50 = vsel %vm331_vm4, %v346_v46, 0.0 }
  0xc1   :  { %v357_v51 = vrot.slane %v356_v50, 4 }
  0xc2   :  { %v365_v52 = vadd.f32 %v364_v48, %v363_v45  ;;  %v351_v53 = vadd.f32 %v350_v49, %v349_v47 }
  0xc3   :  { %v358_v54 = vadd.f32 %v357_v51, %v356_v50 }
  0xc4   :  { %v366_v55 = vrot.slane %v365_v52, 2  ;;  %v352_v56 = vrot.slane %v351_v53, 2 }
  0xc5   :  { %v359_v57 = vrot.slane %v358_v54, 2 }
  0xc6   :  { %v367_v58 = vadd.f32 %v366_v55, %v365_v52  ;;  %v353_v59 = vadd.f32 %v352_v56, %v351_v53 }
  0xc7   :  { %v360_v60 = vadd.f32 %v359_v57, %v358_v54 }
  0xc8   :  { %v368_v61 = vrot.slane %v367_v58, 1  ;;  %v354_v62 = vrot.slane %v353_v59, 1 }
  0xc9   :  { %v361_v63 = vrot.slane %v360_v60, 1 }
  0xca   :  { %v369_v0 = vadd.f32 %v368_v61, %v367_v58  ;;  %v355_v3 = vadd.f32 %v354_v62, %v353_v59 }
  0xcb   :  { %v362_v1 = vadd.f32 %v361_v63, %v360_v60 }
  0xcc   :  { %v374_v2 = vrot.slane %v369_v0, 6 }
  0xcd   :  { %v373_v4 = vrot.slane %v362_v1, 7 }
  0xcf   :  { %v376_v6 = vsel %vm375_vm11, %v355_v3, %v373_v4 }
  0xd0   :  { %v377_v7 = vsel %vm331_vm4, %v376_v6, %v374_v2 }
  0xd1   :  { %v379_v8 = vadd.f32 %v377_v7, %v348_v5 }
  0xd3   :  { %384 = vst.msk [vmem:[#allocation8] sm:$0x7] %vm645_vm3, %v379_v8 }
  0xd4   :  { %395 = dma.vmem_to_hbm [thread:$0]  %s391_s2, 48, %s393_s30, [#allocation4]  }
  0xd5   :  { %607 = dma.done.wait [#allocation4], 48  }
  0xd6   :  { %608 = vsyncadd [#allocation4], 4294967248 }
  0xd7   :  { %400 = vsyncpa [#allocation3], 1 }
  0xd8   :  { %401 = vsyncpa [#allocation6], 1 }
  0xd9   :  { %402 = vsyncpa [#allocation4], 1 }

</bundles_post_ra>
